<compile_context>
chip_gen: v7x
topology: tpu7x:2x2x1
jax: 0.10.0
libtpu: 0.0.40
codegen_flags: <defaults>
</compile_context>

<pallas_src>
import math

import jax
import jax.numpy as jnp
from jax.experimental import pallas as pl
from jax.experimental.pallas import tpu as pltpu


# ----------------------------------------------------------------------------
# Buffer construction (deterministic, mirrors nn.Module.__init__)
# ----------------------------------------------------------------------------
def make_fixed_pe(d_model: int, max_len: int = 1024, scale_factor: float = 1.0):
    """Builds the (max_len, d_model) sinusoidal PE table (float32)."""
    position = jnp.arange(0, max_len, dtype=jnp.float32)[:, None]          # (L, 1)
    div_term = jnp.exp(
        jnp.arange(0, d_model, 2, dtype=jnp.float32) * (-math.log(10000.0) / d_model)
    )                                                                       # (d/2,)
    ang = position * div_term                                               # (L, d/2)
    pe = jnp.zeros((max_len, d_model), dtype=jnp.float32)
    pe = pe.at[:, 0::2].set(jnp.sin(ang))
    pe = pe.at[:, 1::2].set(jnp.cos(ang))
    return scale_factor * pe                                                # (L, d)


# ----------------------------------------------------------------------------
# Kernel factory
# ----------------------------------------------------------------------------
def _make_kernel(*, batch, d_model, flat_layout, p, training, out_dtype):
    apply_dropout = bool(training) and float(p) > 0.0
    keep_prob = 1.0 - float(p)
    inv_keep = (1.0 / keep_prob) if apply_dropout else 1.0
    threshold = (
        min(int(round(keep_prob * 4294967296.0)), 0xFFFFFFFF) if apply_dropout else 0
    )

    def kernel(*refs):
        if apply_dropout:
            seed_ref, x_ref, pe_ref, o_ref = refs
            # Distinct stream per grid step.
            pltpu.prng_seed(seed_ref[0] + pl.program_id(0))
        else:
            x_ref, pe_ref, o_ref = refs

        def dropout(y):
            if not apply_dropout:
                return y
            bits = pltpu.prng_random_bits(y.shape)
            if bits.dtype != jnp.dtype(jnp.uint32):   # only bitcast if needed
                bits = pltpu.bitcast(bits, jnp.uint32)
            keep = bits < jnp.uint32(threshold)
            return jnp.where(keep, y * inv_keep, jnp.zeros_like(y))

        if flat_layout:
            # x_ref / o_ref : (tile_s, B * D)   pe_ref : (tile_s, D)
            pe_tile = pe_ref[...].astype(jnp.float32)
            for b in range(batch):
                sl = slice(b * d_model, (b + 1) * d_model)   # static, lane-aligned
                y = x_ref[:, sl].astype(jnp.float32) + pe_tile
                o_ref[:, sl] = dropout(y).astype(out_dtype)
        else:
            # x_ref / o_ref : (tile_s, B, D)   pe_ref : (tile_s, 1, D)
            # Sublane broadcast over batch; no materialized temporary.
            y = x_ref[...].astype(jnp.float32) + pe_ref[...].astype(jnp.float32)
            o_ref[...] = dropout(y).astype(out_dtype)

    return kernel


# ----------------------------------------------------------------------------
# Tile selection (generation-aware, dtype-aware)
# ----------------------------------------------------------------------------
def _sublane_multiple(dtype):
    size = jnp.dtype(dtype).itemsize
    if size >= 4:
        return 8
    if size == 2:
        return 16
    return 32


def _vmem_budget_bytes():
    kind = ""
    try:
        kind = jax.devices()[0].device_kind.lower()
    except Exception:
        pass
    if ("v5e" in kind) or ("v5 lite" in kind) or ("v5lite" in kind):
        return 12 << 20          # stay under v5e's 16 MiB default scoped limit
    if "v6" in kind:
        return 48 << 20          # v6e: 128 MiB physical, plenty of headroom
    if "7" in kind:
        return 40 << 20          # v7x: 64 MiB physical, leave headroom
    return 24 << 20              # unknown backend: conservative


def _round_up(x, m):
    return ((x + m - 1) // m) * m


def _choose_tile_s(S, row_bytes_x, row_bytes_out, row_bytes_pe, sub, budget):
    # Double-buffered footprint per seq-row: 2 * (x_in + out + pe).
    per_row = 2 * (row_bytes_x + row_bytes_out + row_bytes_pe)
    tile = max(sub, (budget // max(1, per_row)) // sub * sub)
    # Keep >= ~4 grid steps: shards across v7x's 2 TCs and keeps DMA overlapped.
    cap = max(sub, _round_up((S + 3) // 4, sub))
    tile = min(tile, cap)
    if tile >= S:
        return S                  # full dim is always a legal block
    return tile


# ----------------------------------------------------------------------------
# Wrapper
# ----------------------------------------------------------------------------
def fixed_positional_encoding(x, pe_table, *, p=0.1, training=False, seed=0):
    """x: [seq, batch, d_model] -> [seq, batch, d_model] (promoted dtype)."""
    S, B, D = x.shape
    pe_slice = pe_table[:S, :]                                   # (S, D), f32
    out_dtype = jnp.result_type(x.dtype, pe_slice.dtype)         # PyTorch promotion

    x_itemsize = jnp.dtype(x.dtype).itemsize
    out_itemsize = jnp.dtype(out_dtype).itemsize
    pe_itemsize = jnp.dtype(pe_slice.dtype).itemsize

    flat_layout = (B == 1) or (D % 128 == 0)
    sub = _sublane_multiple(x.dtype)
    budget = _vmem_budget_bytes()
    tile_s = _choose_tile_s(
        S,
        row_bytes_x=B * D * x_itemsize,
        row_bytes_out=B * D * out_itemsize,
        row_bytes_pe=D * pe_itemsize,
        sub=sub,
        budget=budget,
    )
    grid = (pl.cdiv(S, tile_s),)

    apply_dropout = bool(training) and float(p) > 0.0
    kernel = _make_kernel(
        batch=B, d_model=D, flat_layout=flat_layout,
        p=float(p), training=bool(training), out_dtype=out_dtype,
    )

    if flat_layout:
        x_in = x.reshape(S, B * D)                               # free merge of minor dims
        pe_in = pe_slice                                         # (S, D)
        x_spec = pl.BlockSpec((tile_s, B * D), lambda i: (i, 0))
        pe_spec = pl.BlockSpec((tile_s, D), lambda i: (i, 0))
        out_spec = pl.BlockSpec((tile_s, B * D), lambda i: (i, 0))
        out_shape = jax.ShapeDtypeStruct((S, B * D), out_dtype)
    else:
        # TODO(synk): for small d_model not a multiple of 128, stores are
        # masked partial-lane vst; padding D to 128 in the wrapper would make
        # them dense at the cost of an extra copy.
        x_in = x                                                 # (S, B, D)
        pe_in = pe_slice.reshape(S, 1, D)
        x_spec = pl.BlockSpec((tile_s, B, D), lambda i: (i, 0, 0))
        pe_spec = pl.BlockSpec((tile_s, 1, D), lambda i: (i, 0, 0))
        out_spec = pl.BlockSpec((tile_s, B, D), lambda i: (i, 0, 0))
        out_shape = jax.ShapeDtypeStruct((S, B, D), out_dtype)

    in_specs = [x_spec, pe_spec]
    args = [x_in, pe_in]
    if apply_dropout:
        in_specs = [pl.BlockSpec(memory_space=pltpu.MemorySpace.SMEM)] + in_specs
        args = [jnp.asarray([int(seed)], dtype=jnp.int32)] + args

    # vmem limit from the actual double-buffered footprint (+ headroom).
    footprint = 2 * tile_s * (B * D * x_itemsize + B * D * out_itemsize + D * pe_itemsize)
    vmem_limit = int(min(max(footprint + (8 << 20), 16 << 20), 48 << 20))

    cost = pl.CostEstimate(
        flops=S * B * D,
        transcendentals=0,
        bytes_accessed=S * B * D * (x_itemsize + out_itemsize) + S * D * pe_itemsize,
    )

    y = pl.pallas_call(
        kernel,
        out_shape=out_shape,
        grid=grid,
        in_specs=in_specs,
        out_specs=out_spec,
        compiler_params=pltpu.CompilerParams(
            dimension_semantics=("parallel",),        # megacore sharding on v7x
            vmem_limit_bytes=vmem_limit,
        ),
        cost_estimate=cost,
    )(*args)

    return y.reshape(S, B, D)


# ----------------------------------------------------------------------------
# Demo / correctness check
# ----------------------------------------------------------------------------
if __name__ == "__main__":
    drop_p = 0.1
    key = jax.random.PRNGKey(0)

    # --- case 1: small d_model (3-D broadcast path), eval mode ---------------
    S1, B1, D1 = 8, 2, 32
    pe1 = make_fixed_pe(D1, max_len=64, scale_factor=1.0)
    x1 = jax.random.normal(key, (S1, B1, D1), dtype=jnp.float32)
    ref1 = x1 + pe1[:S1][:, None, :]
    out1 = jax.block_until_ready(
        fixed_positional_encoding(x1, pe1, p=drop_p, training=False)
    )
    assert out1.shape == (S1, B1, D1)
    assert jnp.allclose(out1, ref1, atol=1e-6, rtol=1e-6), "eval-mode mismatch (3-D path)"

    # --- case 2: lane-dense flat path (d_model % 128 == 0), eval mode --------
    S2, B2, D2 = 16, 2, 128
    pe2 = make_fixed_pe(D2, max_len=64, scale_factor=1.0)
    x2 = jax.random.normal(jax.random.PRNGKey(1), (S2, B2, D2), dtype=jnp.float32)
    ref2 = x2 + pe2[:S2][:, None, :]
    out2 = jax.block_until_ready(
        fixed_positional_encoding(x2, pe2, p=drop_p, training=False)
    )
    assert out2.shape == (S2, B2, D2)
    assert jnp.allclose(out2, ref2, atol=1e-6, rtol=1e-6), "eval-mode mismatch (flat path)"

    # --- training mode (on-chip PRNG): TPU backend only -----------------------
    if jax.default_backend() == "tpu":
        out_tr = jax.block_until_ready(
            fixed_positional_encoding(x2, pe2, p=drop_p, training=True, seed=123)
        )
        assert out_tr.shape == (S2, B2, D2)
        # Kept elements equal ref / (1 - p); dropped are 0 (out==0 test is a
        # test-only heuristic; x+pe is never exactly zero for random inputs).
        recon = jnp.where(out_tr == 0.0, ref2, out_tr * (1.0 - drop_p))
        assert jnp.allclose(recon, ref2, atol=1e-5, rtol=1e-5), \
            "training-mode dropout scaling mismatch"

    print("KERNEL_OK")
</pallas_src>

<mosaic_0001>
module attributes {stable_mosaic.version = 11 : i64} {
  func.func @kernel(%arg0: i32, %arg1: memref<8x2x32xf32, #tpu.memory_space<vmem>>, %arg2: memref<8x1x32xf32, #tpu.memory_space<vmem>>, %arg3: memref<8x2x32xf32, #tpu.memory_space<vmem>>) attributes {dimension_semantics = [#tpu.dimension_semantics<parallel>], iteration_bounds = array<i64: 1>, scalar_prefetch = 0 : i64, scratch_operands = 0 : i64, tpu.core_type = #tpu.core_type<tc>, window_params = [{transform_indices = @transform_0, window_bounds = array<i64: 8, 2, 32>}, {transform_indices = @transform_1, window_bounds = array<i64: 8, 1, 32>}, {transform_indices = @transform_2, window_bounds = array<i64: 8, 2, 32>}]} {
    %c0 = arith.constant 0 : index
    %c0_0 = arith.constant 0 : index
    %c0_1 = arith.constant 0 : index
    %0 = vector.load %arg1[%c0, %c0_0, %c0_1] : memref<8x2x32xf32, #tpu.memory_space<vmem>>, vector<8x2x32xf32>
    %c0_2 = arith.constant 0 : index
    %c0_3 = arith.constant 0 : index
    %c0_4 = arith.constant 0 : index
    %1 = vector.load %arg2[%c0_2, %c0_3, %c0_4] : memref<8x1x32xf32, #tpu.memory_space<vmem>>, vector<8x1x32xf32>
    %2 = vector.broadcast %1 : vector<8x1x32xf32> to vector<8x2x32xf32>
    %3 = arith.addf %0, %2 : vector<8x2x32xf32>
    %c0_5 = arith.constant 0 : index
    %c0_6 = arith.constant 0 : index
    %c0_7 = arith.constant 0 : index
    %4 = vector.load %arg3[%c0_5, %c0_6, %c0_7] : memref<8x2x32xf32, #tpu.memory_space<vmem>>, vector<8x2x32xf32>
    tpu.vector_store %arg3[%c0_5, %c0_6, %c0_7], %3 {strides = array<i32>} : memref<8x2x32xf32, #tpu.memory_space<vmem>>, vector<8x2x32xf32>,
    return
  }
  func.func @transform_0(%arg0: i32) -> (i32, i32, i32) {
    %c0_i32 = arith.constant 0 : i32
    %c0_i32_0 = arith.constant 0 : i32
    %c0_i32_1 = arith.constant 0 : i32
    return %arg0, %c0_i32, %c0_i32_0 : i32, i32, i32
  }
  func.func @transform_1(%arg0: i32) -> (i32, i32, i32) {
    %c0_i32 = arith.constant 0 : i32
    %c0_i32_0 = arith.constant 0 : i32
    %c0_i32_1 = arith.constant 0 : i32
    return %arg0, %c0_i32, %c0_i32_0 : i32, i32, i32
  }
  func.func @transform_2(%arg0: i32) -> (i32, i32, i32) {
    %c0_i32 = arith.constant 0 : i32
    %c0_i32_0 = arith.constant 0 : i32
    %c0_i32_1 = arith.constant 0 : i32
    return %arg0, %c0_i32, %c0_i32_0 : i32, i32, i32
  }
}

</mosaic_0001>

<bundles_post_ra>
// kernel: tpu_custom_call.1
= control target key start
LH: loop header
LB: loop body
LE: loop exit
PB: predicated region body
PF: predicated region fallthrough
CT: control target
= control target key end

     0   :  { %7 = vsyncpa [#allocation3], 0  ;;  %s301_s0 = inlined_call_operand.hbm [shape: f32[8,2,32], index: 0, kind: input, shape index: {}]   ;;  %s302_s1 = inlined_call_operand.hbm [shape: f32[8,1,32], index: 1, kind: input, shape index: {}]   ;;  %s303_s2 = inlined_call_operand.hbm [shape: f32[8,2,32], index: 2, kind: output, shape index: {}]  }
   0x1   :  { %8 = vsyncpa [#allocation6], 0 }
   0x2   :  { %9 = vsyncpa [#allocation4], 0  ;;  %s226_s9 = smov [#allocation2]   ;;  %s154_s13 = scalar_lea.hbm %s301_s0, 256 }
   0x3   :  { %s15_s10 = sshll.u32 %s226_s9, 4  ;;  %p155_p0 = scmp.ne.s32.totalorder %s301_s0, %s154_s13  ;;  %s16_s10 = int_to_ptr.vmem [resolvable:$true] %s15_s10 }
   0x4   :  { %p158_p1 = scmp.lt.u32.totalorder %s154_s13, %s301_s0 }
   0x6   :  { %p160_p2 = pnand %p158_p1, %p155_p0 }
   0x8   :  { %163 = shalt.err (!%p160_p2)
}
   0x9   :  { %s164_s18 = scalar_lea.vmem %s16_s10, 256  ;;  %p169_p4 = scmp.lt.s32.totalorder %s16_s10, %s16_s10 }
   0xa   :  { %p165_p3 = scmp.ne.s32.totalorder %s16_s10, %s164_s18  ;;  %p170_p5 = scmp.lt.s32.totalorder %s164_s18, %s164_s18 }
   0xc   :  { %p171_p6 = por %p170_p5, %p169_p4 }
   0xe   :  { %p172_p7 = pnand %p171_p6, %p165_p3 }
  0x10   :  { %175 = shalt.err (!%p172_p7)
}
  0x11   :  { %s227_s19 = smov 32   ;;  %s228_s20 = smov 2  }
  0x12   :  { %21 = dma.hbm_to_vmem [thread:$0]  %s301_s0, 256, %s16_s10, [#allocation3], %s227_s19, %s227_s19, %s228_s20  }
  0x13   :  { %s229_s23 = smov [#allocation5]   ;;  %s176_s27 = scalar_lea.hbm %s302_s1, 128 }
  0x14   :  { %s27_s24 = sshll.u32 %s229_s23, 4  ;;  %p177_p8 = scmp.ne.s32.totalorder %s302_s1, %s176_s27  ;;  %s28_s24 = int_to_ptr.vmem [resolvable:$true] %s27_s24 }
  0x15   :  { %p180_p9 = scmp.lt.u32.totalorder %s176_s27, %s302_s1 }
  0x17   :  { %p182_p10 = pnand %p180_p9, %p177_p8 }
  0x19   :  { %185 = shalt.err (!%p182_p10)
}
  0x1a   :  { %s186_s4 = scalar_lea.vmem %s28_s24, 128  ;;  %p191_p12 = scmp.lt.s32.totalorder %s28_s24, %s28_s24 }
  0x1b   :  { %p187_p11 = scmp.ne.s32.totalorder %s28_s24, %s186_s4  ;;  %p192_p13 = scmp.lt.s32.totalorder %s186_s4, %s186_s4 }
  0x1d   :  { %p193_p0 = por %p192_p13, %p191_p12 }
  0x1f   :  { %p194_p1 = pnand %p193_p0, %p187_p11 }
  0x21   :  { %197 = shalt.err (!%p194_p1)
}
  0x22   :  { %s230_s0 = smov 16   ;;  %s231_s5 = smov 1  }
  0x23   :  { %33 = dma.hbm_to_vmem [thread:$0]  %s302_s1, 128, %s28_s24, [#allocation6], %s230_s0, %s230_s0, %s231_s5  }
  0x24   :  { %220 = dma.done.wait [#allocation3], 256  }
  0x25   :  { %221 = vsyncadd [#allocation3], 4294967040 }
  0x26   :  { %222 = dma.done.wait [#allocation6], 128  }
  0x27   :  { %223 = vsyncadd [#allocation6], 4294967168  ;;  %vm112_vm0 = vcmask 254976   ;;  %s232_s8 = smov [#allocation7]   ;;  %v40_v0 = vld [vmem:[#allocation2] sm:$0x3] }
  0x28   :  { %s275_s9 = sshll.u32 %s232_s8, 4  ;;  %v139_v1 = vld [vmem:[#allocation5] ss:$0 sm:$0xff]  ;;  %v41_v2 = vld [vmem:[#allocation2 + $0x2] sm:$0x3]  ;;  %s127_s9 = int_to_ptr.vmem [resolvable:$true] %s275_s9 }
  0x29   :  { %v104_v3 = vadd.f32 %v139_v1, %v40_v0  ;;  %v140_v4 = vld [vmem:[#allocation5 + $0x1] ss:$0 sm:$0xff]  ;;  %v42_v5 = vld [vmem:[#allocation2 + $0x4] sm:$0x3]  ;;  %v141_v6 = vld [vmem:[#allocation5 + $0x2] ss:$0 sm:$0xff]  ;;  %p203_p3 = scmp.lt.s32.totalorder %s127_s9, %s127_s9 }
  0x2a   :  { %v105_v7 = vadd.f32 %v140_v4, %v41_v2  ;;  %v106_v8 = vadd.f32 %v141_v6, %v42_v5  ;;  %v43_v9 = vld [vmem:[#allocation2 + $0x6] sm:$0x3]  ;;  %v142_v10 = vld [vmem:[#allocation5 + $0x3] ss:$0 sm:$0xff]  ;;  %v44_v11 = vld [vmem:[#allocation2 + $0x8] sm:$0x3] }
  0x2b   :  { %113 = vst.msk [vmem:[#allocation7] sm:$0x3] %vm112_vm0, %v104_v3  ;;  %v107_v12 = vadd.f32 %v142_v10, %v43_v9  ;;  %v143_v13 = vld [vmem:[#allocation5 + $0x4] ss:$0 sm:$0xff]  ;;  %v45_v14 = vld [vmem:[#allocation2 + $0xa] sm:$0x3] }
  0x2c   :  { %v144_v15 = vld [vmem:[#allocation5 + $0x5] ss:$0 sm:$0xff]  ;;  %114 = vst.msk [vmem:[#allocation7 + $0x2] sm:$0x3] %vm112_vm0, %v105_v7  ;;  %115 = vst.msk [vmem:[#allocation7 + $0x4] sm:$0x3] %vm112_vm0, %v106_v8  ;;  %v108_v16 = vadd.f32 %v143_v13, %v44_v11 }
  0x2d   :  { %v109_v17 = vadd.f32 %v144_v15, %v45_v14  ;;  %v46_v18 = vld [vmem:[#allocation2 + $0xc] sm:$0x3]  ;;  %v145_v19 = vld [vmem:[#allocation5 + $0x6] ss:$0 sm:$0xff]  ;;  %v47_v20 = vld [vmem:[#allocation2 + $0xe] sm:$0x3] }
  0x2e   :  { %116 = vst.msk [vmem:[#allocation7 + $0x6] sm:$0x3] %vm112_vm0, %v107_v12  ;;  %v110_v21 = vadd.f32 %v145_v19, %v46_v18  ;;  %v146_v22 = vld [vmem:[#allocation5 + $0x7] ss:$0 sm:$0xff]  ;;  %117 = vst.msk [vmem:[#allocation7 + $0x8] sm:$0x3] %vm112_vm0, %v108_v16 }
  0x2f   :  { %118 = vst.msk [vmem:[#allocation7 + $0xa] sm:$0x3] %vm112_vm0, %v109_v17  ;;  %v111_v23 = vadd.f32 %v146_v22, %v47_v20  ;;  %s198_s1 = scalar_lea.vmem %s127_s9, 256 }
  0x30   :  { %119 = vst.msk [vmem:[#allocation7 + $0xc] sm:$0x3] %vm112_vm0, %v110_v21  ;;  %p199_p2 = scmp.ne.s32.totalorder %s127_s9, %s198_s1  ;;  %p204_p4 = scmp.lt.s32.totalorder %s198_s1, %s198_s1 }
  0x31   :  { %120 = vst.msk [vmem:[#allocation7 + $0xe] sm:$0x3] %vm112_vm0, %v111_v23 }
  0x32   :  { %p205_p5 = por %p204_p4, %p203_p3 }
  0x34   :  { %p206_p6 = pnand %p205_p5, %p199_p2 }
  0x36   :  { %209 = shalt.err (!%p206_p6)
}
  0x37   :  { %s210_s12 = scalar_lea.hbm %s303_s2, 256 }
  0x38   :  { %p211_p7 = scmp.ne.s32.totalorder %s303_s2, %s210_s12  ;;  %p214_p8 = scmp.lt.u32.totalorder %s210_s12, %s303_s2 }
  0x3a   :  { %p216_p9 = pnand %p214_p8, %p211_p7 }
  0x3c   :  { %219 = shalt.err (!%p216_p9)
}
  0x3d   :  { %132 = dma.vmem_to_hbm [thread:$0]  %s127_s9, 256, %s303_s2, [#allocation4], %s227_s19, %s227_s19, %s228_s20  }
  0x3e   :  { %224 = dma.done.wait [#allocation4], 256  }
  0x3f   :  { %225 = vsyncadd [#allocation4], 4294967040 }
  0x40   :  { %136 = vsyncpa [#allocation3], 1 }
  0x41   :  { %137 = vsyncpa [#allocation6], 1 }
  0x42   :  { %138 = vsyncpa [#allocation4], 1 }

</bundles_post_ra>
